<compile_context>
chip_gen: v7x
topology: tpu7x:2x2x1
jax: 0.10.0
libtpu: 0.0.40
codegen_flags: <defaults>
</compile_context>

<pallas_src>
import jax
import jax.numpy as jnp
from jax.experimental import pallas as pl
from jax.experimental.pallas import tpu as pltpu


def _sigmoid_kernel(x_ref, o_ref):
    # Elementwise sigmoid: exp on the EUP, the rest on the VPU.
    o_ref[...] = jax.nn.sigmoid(x_ref[...])


def sigmoid_pallas(x: jax.Array) -> jax.Array:
    """Applies sigmoid elementwise, matching torch.nn.Sigmoid semantics."""
    orig_shape = x.shape
    n = x.size

    # Present the data as a single 2-D (1, n) slab; the whole array is one
    # block, so no (8, 128) divisibility requirement and no padding/slicing.
    x2d = x.reshape(1, n)

    out = pl.pallas_call(
        _sigmoid_kernel,
        out_shape=jax.ShapeDtypeStruct((1, n), x.dtype),
        in_specs=[pl.BlockSpec(memory_space=pltpu.MemorySpace.VMEM)],
        out_specs=pl.BlockSpec(memory_space=pltpu.MemorySpace.VMEM),
        # Same shape/dtype in and out; write the result back in place.
        input_output_aliases={0: 0},
    )(x2d)

    return out.reshape(orig_shape)


if __name__ == "__main__":
    key = jax.random.PRNGKey(0)
    # Same shape as the original module's input: [1, 1824, 1, 1], float32.
    x632 = jax.random.normal(key, (1, 1824, 1, 1), dtype=jnp.float32)

    y = sigmoid_pallas(x632)
    jax.block_until_ready(y)

    # Sanity check against pure-JAX reference.
    ref = jax.nn.sigmoid(x632)
    assert y.shape == x632.shape and y.dtype == x632.dtype
    assert jnp.allclose(y, ref, atol=1e-6, rtol=1e-6)

    print("KERNEL_OK")
</pallas_src>

<mosaic_0001>
module attributes {stable_mosaic.version = 11 : i64} {
  func.func @_sigmoid_kernel(%arg0: memref<1x1824xf32, #tpu.memory_space<vmem>>, %arg1: memref<1x1824xf32, #tpu.memory_space<vmem>>) attributes {dimension_semantics = [], scalar_prefetch = 0 : i64, scratch_operands = 0 : i64, tpu.core_type = #tpu.core_type<tc>} {
    %c0 = arith.constant 0 : index
    %c0_0 = arith.constant 0 : index
    %0 = vector.load %arg0[%c0, %c0_0] : memref<1x1824xf32, #tpu.memory_space<vmem>>, vector<1x1824xf32>
    %1 = arith.negf %0 : vector<1x1824xf32>
    %2 = math.exp %1 : vector<1x1824xf32>
    %cst = arith.constant 1.000000e+00 : f32
    %3 = vector.broadcast %cst : f32 to vector<1x1824xf32>
    %4 = arith.addf %3, %2 : vector<1x1824xf32>
    %5 = arith.divf %3, %4 : vector<1x1824xf32>
    %c0_1 = arith.constant 0 : index
    %c0_2 = arith.constant 0 : index
    %6 = vector.load %arg1[%c0_1, %c0_2] : memref<1x1824xf32, #tpu.memory_space<vmem>>, vector<1x1824xf32>
    tpu.vector_store %arg1[%c0_1, %c0_2], %5 {strides = array<i32>} : memref<1x1824xf32, #tpu.memory_space<vmem>>, vector<1x1824xf32>,
    return
  }
}

</mosaic_0001>

<bundles_post_ra>
// kernel: tpu_custom_call.1
= control target key start
LH: loop header
LB: loop body
LE: loop exit
PB: predicated region body
PF: predicated region fallthrough
CT: control target
= control target key end

     0   :  { %6 = vsyncpa [#allocation3], 0  ;;  %s152_s0 = inlined_call_operand.hbm [shape: f32[1,1824], index: 0, kind: input, shape index: {}, may-alias: {0,1}]   ;;  %s153_s1 = inlined_call_operand.hbm [shape: f32[1,1824], index: 1, kind: output, shape index: {}, may-alias: {0,1}]  }
   0x1   :  { %7 = vsyncpa [#allocation4], 0  ;;  %s116_s6 = smov [#allocation2]   ;;  %s68_s10 = scalar_lea.hbm %s152_s0, 240 }
   0x2   :  { %s14_s7 = sshll.u32 %s116_s6, 4  ;;  %p69_p0 = scmp.ne.s32.totalorder %s152_s0, %s68_s10  ;;  %s15_s7 = int_to_ptr.vmem [resolvable:$true] %s14_s7 }
   0x3   :  { %p72_p1 = scmp.lt.u32.totalorder %s68_s10, %s152_s0 }
   0x5   :  { %p74_p2 = pnand %p72_p1, %p69_p0 }
   0x7   :  { %77 = shalt.err (!%p74_p2)
}
   0x8   :  { %s78_s15 = scalar_lea.vmem %s15_s7, 240  ;;  %s82_s16 = scalar_lea.vmem %s15_s7, 256 }
   0x9   :  { %p79_p3 = scmp.ne.s32.totalorder %s15_s7, %s78_s15  ;;  %p83_p4 = scmp.lt.s32.totalorder %s15_s7, %s15_s7 }
   0xa   :  { %p84_p5 = scmp.lt.s32.totalorder %s82_s16, %s78_s15 }
   0xc   :  { %p85_p6 = por %p84_p5, %p83_p4 }
   0xe   :  { %p86_p7 = pnand %p85_p6, %p79_p3 }
  0x10   :  { %89 = shalt.err (!%p86_p7)
}
  0x11   :  { %17 = dma.hbm_to_vmem [thread:$0]  %s152_s0, 240, %s15_s7, [#allocation3]  }
  0x12   :  { %112 = dma.done.wait [#allocation3], 240  }
  0x13   :  { %113 = vsyncadd [#allocation3], 4294967056  ;;  %v21_v0 = vld [vmem:[#allocation2] sm:$0xff]  ;;  %v22_v1 = vld [vmem:[#allocation2 + $0x8] sm:$0x7f]  ;;  %v36_v8 = vlaneseq  ;;  %s117_s19 = smov [#allocation5]  }
  0x14   :  { %v56_v2 = vmul.f32 -1.442695, %v21_v0  ;;  %v57_v3 = vmul.f32 -1.442695, %v22_v1  ;;  %s47_s20 = sshll.u32 %s117_s19, 4  ;;  %s48_s20 = int_to_ptr.vmem [resolvable:$true] %s47_s20 }
  0x15   :  { %vm38_vm0 = vcmp.lt.s32.totalorder %v36_v8, 800  ;;  %s90_s0 = scalar_lea.vmem %s48_s20, 240  ;;  %s94_s21 = scalar_lea.vmem %s48_s20, 256 }
  0x16   :  { %60 = vpow2.f32 %v56_v2  ;;  %p91_p8 = scmp.ne.s32.totalorder %s48_s20, %s90_s0  ;;  %p95_p9 = scmp.lt.s32.totalorder %s48_s20, %s48_s20 }
  0x17   :  { %62 = vpow2.f32 %v57_v3  ;;  %p96_p10 = scmp.lt.s32.totalorder %s94_s21, %s90_s0 }
  0x19   :  { %p97_p11 = por %p96_p10, %p95_p9 }
  0x1b   :  { %p98_p12 = pnand %p97_p11, %p91_p8 }
  0x20   :  { %v61_v4 = vpop.eup %60 }
  0x21   :  { %v63_v5 = vpop.eup %62  ;;  %v29_v6 = vadd.f32 1.0, %v61_v4 }
  0x22   :  { %v30_v7 = vadd.f32 1.0, %v63_v5 }
  0x23   :  { %64 = vrcp.f32 %v29_v6 }
  0x24   :  { %66 = vrcp.f32 %v30_v7 }
  0x2d   :  { %v65_v9 = vpop.eup %64 }
  0x2e   :  { %v67_v10 = vpop.eup %66  ;;  %35 = vst [vmem:[#allocation5] sm:$0xff] %v65_v9 }
  0x2f   :  { %40 = vst.msk [vmem:[#allocation5 + $0x8] sm:$0x7f] %vm38_vm0, %v67_v10 }
  0x30   :  { %101 = shalt.err (!%p98_p12)
}
  0x31   :  { %s102_s24 = scalar_lea.hbm %s153_s1, 240 }
  0x32   :  { %p103_p13 = scmp.ne.s32.totalorder %s153_s1, %s102_s24  ;;  %p106_p0 = scmp.lt.u32.totalorder %s102_s24, %s153_s1 }
  0x34   :  { %p108_p1 = pnand %p106_p0, %p103_p13 }
  0x36   :  { %111 = shalt.err (!%p108_p1)
}
  0x37   :  { %50 = dma.vmem_to_hbm [thread:$0]  %s48_s20, 240, %s153_s1, [#allocation4]  }
  0x38   :  { %114 = dma.done.wait [#allocation4], 240  }
  0x39   :  { %115 = vsyncadd [#allocation4], 4294967056 }
  0x3a   :  { %54 = vsyncpa [#allocation3], 1 }
  0x3b   :  { %55 = vsyncpa [#allocation4], 1 }

</bundles_post_ra>
